<compile_context>
chip_gen: v7x
topology: tpu7x:2x2x1
jax: 0.10.0
libtpu: 0.0.40
codegen_flags: <defaults>
</compile_context>

<pallas_src>
import jax
import jax.numpy as jnp
from jax.experimental import pallas as pl
from jax.experimental.pallas import tpu as pltpu

LANES = 128
TILE_ROWS = 8192          # 8192 x 128 f32 = 4 MiB per block
MIN_SPLIT_ROWS = 1024     # above this, guarantee >= 2 grid steps (v7x megacore)
VMEM_LIMIT_BYTES = 32 * 1024 * 1024


def morse_kernel(params_ref, x_ref, o_ref):
    # params_ref lives in SMEM: [De, -a, a*re, v] (algebra pre-folded on host).
    De = params_ref[0]
    neg_a = params_ref[1]
    a_re = params_ref[2]
    v = params_ref[3]
    x = x_ref[...]
    # 1 - exp(-a*(x - re)) == 1 - exp(-a*x + a*re)
    t = 1.0 - jnp.exp(neg_a * x + a_re)
    o_ref[...] = De * t * t + v


def _round_up(x, m):
    return -(-x // m) * m


def morse_pallas(x, De, a, re, v):
    """Elementwise Morse potential on a float32 array of any shape."""
    orig_shape = x.shape
    orig_size = x.size

    x_flat = jnp.ravel(x).astype(jnp.float32)

    # Lane-dense layout: (n_rows, 128).
    n_rows = pl.cdiv(orig_size, LANES)
    padded_size = n_rows * LANES
    if padded_size != orig_size:
        # Fallback for non-lane-aligned sizes (not taken for the test shape).
        x_flat = jnp.pad(x_flat, (0, padded_size - orig_size))
    x2d = x_flat.reshape(n_rows, LANES)

    # Tile selection:
    #   * tiny inputs: single full-extent block (legal for any row count)
    #   * medium inputs: split into >=2 tiles (rows multiple of 8) for v7x TCs
    #   * large inputs: 4 MiB tiles to amortize per-grid-step overhead
    if n_rows <= MIN_SPLIT_ROWS:
        tile_rows = n_rows
    else:
        tile_rows = min(TILE_ROWS, _round_up(pl.cdiv(n_rows, 2), 8))
    n_tiles = pl.cdiv(n_rows, tile_rows)

    params = jnp.array([De, -a, a * re, v], dtype=jnp.float32)

    n = orig_size
    cost = pl.CostEstimate(flops=6 * n, transcendentals=n, bytes_accessed=8 * n)

    out2d = pl.pallas_call(
        morse_kernel,
        out_shape=jax.ShapeDtypeStruct((n_rows, LANES), jnp.float32),
        grid=(n_tiles,),
        in_specs=[
            # Scalar parameters: whole (4,) array resident in SMEM.
            pl.BlockSpec(memory_space=pltpu.MemorySpace.SMEM),
            # Row-tiled, lane-dense input.
            pl.BlockSpec((tile_rows, LANES), lambda i: (i, 0)),
        ],
        out_specs=pl.BlockSpec((tile_rows, LANES), lambda i: (i, 0)),
        compiler_params=pltpu.CompilerParams(
            dimension_semantics=("parallel",),
            vmem_limit_bytes=VMEM_LIMIT_BYTES,
        ),
        cost_estimate=cost,
    )(params, x2d)

    out_flat = out2d.reshape(-1)
    if padded_size != orig_size:
        out_flat = out_flat[:orig_size]
    return out_flat.reshape(orig_shape)


def morse_reference(x, De, a, re, v):
    return De * (1.0 - jnp.exp(-a * (x - re))) ** 2 + v


if __name__ == "__main__":
    # Deterministic parameter init matching MorseModel.__init__
    De = jnp.float32(4.0)
    a = jnp.float32(3.0)
    re = jnp.float32(0.7)
    v = jnp.float32(0.0)

    key = jax.random.PRNGKey(0)
    x = jax.random.normal(key, (2, 4, 16, 16), dtype=jnp.float32)

    out = morse_pallas(x, De, a, re, v)
    out = jax.block_until_ready(out)

    ref = morse_reference(x, De, a, re, v)
    assert out.shape == x.shape and out.dtype == jnp.float32
    assert jnp.allclose(out, ref, atol=1e-5, rtol=1e-5), "mismatch vs reference"

    print("KERNEL_OK")
</pallas_src>

<mosaic_0001>
module attributes {stable_mosaic.version = 11 : i64} {
  func.func @morse_kernel(%arg0: i32, %arg1: memref<4xf32, #tpu.memory_space<smem>>, %arg2: memref<16x128xf32, #tpu.memory_space<vmem>>, %arg3: memref<16x128xf32, #tpu.memory_space<vmem>>) attributes {dimension_semantics = [#tpu.dimension_semantics<parallel>], iteration_bounds = array<i64: 1>, scalar_prefetch = 0 : i64, scratch_operands = 0 : i64, tpu.core_type = #tpu.core_type<tc>, window_params = [{transform_indices = @transform_0, window_bounds = array<i64: 4>}, {transform_indices = @transform_1, window_bounds = array<i64: 16, 128>}, {transform_indices = @transform_2, window_bounds = array<i64: 16, 128>}]} {
    %c0 = arith.constant 0 : index
    %0 = memref.load %arg1[%c0] : memref<4xf32, #tpu.memory_space<smem>>
    %c1 = arith.constant 1 : index
    %1 = memref.load %arg1[%c1] : memref<4xf32, #tpu.memory_space<smem>>
    %c2 = arith.constant 2 : index
    %2 = memref.load %arg1[%c2] : memref<4xf32, #tpu.memory_space<smem>>
    %c3 = arith.constant 3 : index
    %3 = memref.load %arg1[%c3] : memref<4xf32, #tpu.memory_space<smem>>
    %c0_0 = arith.constant 0 : index
    %c0_1 = arith.constant 0 : index
    %4 = vector.load %arg2[%c0_0, %c0_1] : memref<16x128xf32, #tpu.memory_space<vmem>>, vector<16x128xf32>
    %5 = vector.broadcast %1 : f32 to vector<16x128xf32>
    %6 = arith.mulf %5, %4 : vector<16x128xf32>
    %7 = vector.broadcast %2 : f32 to vector<16x128xf32>
    %8 = arith.addf %6, %7 : vector<16x128xf32>
    %9 = math.exp %8 : vector<16x128xf32>
    %cst = arith.constant 1.000000e+00 : f32
    %10 = vector.broadcast %cst : f32 to vector<16x128xf32>
    %11 = arith.subf %10, %9 : vector<16x128xf32>
    %12 = vector.broadcast %0 : f32 to vector<16x128xf32>
    %13 = arith.mulf %12, %11 : vector<16x128xf32>
    %14 = arith.mulf %13, %11 : vector<16x128xf32>
    %15 = vector.broadcast %3 : f32 to vector<16x128xf32>
    %16 = arith.addf %14, %15 : vector<16x128xf32>
    %c0_2 = arith.constant 0 : index
    %c0_3 = arith.constant 0 : index
    %17 = vector.load %arg3[%c0_2, %c0_3] : memref<16x128xf32, #tpu.memory_space<vmem>>, vector<16x128xf32>
    tpu.vector_store %arg3[%c0_2, %c0_3], %16 {strides = array<i32>} : memref<16x128xf32, #tpu.memory_space<vmem>>, vector<16x128xf32>,
    return
  }
  func.func @transform_0(%arg0: i32) -> i32 {
    %c0_i32 = arith.constant 0 : i32
    %c0_i32_0 = arith.constant 0 : i32
    return %c0_i32 : i32
  }
  func.func @transform_1(%arg0: i32) -> (i32, i32) {
    %c0_i32 = arith.constant 0 : i32
    %c0_i32_0 = arith.constant 0 : i32
    return %arg0, %c0_i32 : i32, i32
  }
  func.func @transform_2(%arg0: i32) -> (i32, i32) {
    %c0_i32 = arith.constant 0 : i32
    %c0_i32_0 = arith.constant 0 : i32
    return %arg0, %c0_i32 : i32, i32
  }
}

</mosaic_0001>

<bundles_post_ra>
// kernel: tpu_custom_call.1
= control target key start
LH: loop header
LB: loop body
LE: loop exit
PB: predicated region body
PF: predicated region fallthrough
CT: control target
= control target key end

     0   :  { %7 = vsyncpa [#allocation5], 0  ;;  %s217_s0 = inlined_call_operand.hbm [shape: f32[4], index: 0, kind: input, shape index: {}]   ;;  %s218_s1 = inlined_call_operand.hbm [shape: f32[16,128], index: 1, kind: input, shape index: {}]   ;;  %s219_s2 = inlined_call_operand.hbm [shape: f32[16,128], index: 2, kind: output, shape index: {}]  }
   0x1   :  { %8 = vsyncpa [#allocation3], 0 }
   0x2   :  { %9 = vsyncpa [#allocation4], 0  ;;  %s95_s11 = scalar_lea.hbm %s217_s0, 16 }
   0x3   :  { %p96_p0 = scmp.ne.s32.totalorder %s217_s0, %s95_s11  ;;  %p99_p1 = scmp.lt.u32.totalorder %s95_s11, %s217_s0 }
   0x5   :  { %p101_p2 = pnand %p99_p1, %p96_p0 }
   0x7   :  { %104 = shalt.err (!%p101_p2)
}
   0x8   :  { %s155_s16 = smov [#allocation2]   ;;  %s156_s19 = smov [#allocation6]  }
   0x9   :  { %17 = dma.hbm_to_smem %s217_s0, 16, %s155_s16, [#allocation5]  }
   0xa   :  { %s23_s20 = sshll.u32 %s156_s19, 4  ;;  %s105_s23 = scalar_lea.hbm %s218_s1, 256  ;;  %s24_s20 = int_to_ptr.vmem [resolvable:$true] %s23_s20 }
   0xb   :  { %p106_p3 = scmp.ne.s32.totalorder %s218_s1, %s105_s23  ;;  %p109_p4 = scmp.lt.u32.totalorder %s105_s23, %s218_s1 }
   0xd   :  { %p111_p5 = pnand %p109_p4, %p106_p3 }
   0xf   :  { %114 = shalt.err (!%p111_p5)
}
  0x10   :  { %s115_s28 = scalar_lea.vmem %s24_s20, 256  ;;  %p120_p7 = scmp.lt.s32.totalorder %s24_s20, %s24_s20 }
  0x11   :  { %p116_p6 = scmp.ne.s32.totalorder %s24_s20, %s115_s28  ;;  %p121_p8 = scmp.lt.s32.totalorder %s115_s28, %s115_s28 }
  0x13   :  { %p122_p9 = por %p121_p8, %p120_p7 }
  0x15   :  { %p123_p10 = pnand %p122_p9, %p116_p6 }
  0x17   :  { %126 = shalt.err (!%p123_p10)
}
  0x18   :  { %s157_s0 = smov 128   ;;  %s158_s29 = smov 8  }
  0x19   :  { %29 = dma.hbm_to_vmem [thread:$0]  %s218_s1, 256, %s24_s20, [#allocation3], %s157_s0, %s157_s0, %s158_s29  }
  0x1a   :  { %149 = dma.done.wait [#allocation5], 16  }
  0x1b   :  { %150 = vsyncadd [#allocation5], 4294967280 }
  0x1c   :  { %151 = dma.done.wait [#allocation3], 256  }
  0x1d   :  { %152 = vsyncadd [#allocation3], 4294967040 }
  0x1e   :  { %36 = sfence }
  0x1f   :  { %s83_s4 = sld [smem:[#allocation2 + $0x1]]  ;;  %s84_s5 = sld [smem:[#allocation2 + $0x2]]  ;;  %v41_v0 = vld [vmem:[#allocation6] sm:$0xff]  ;;  %v42_v1 = vld [vmem:[#allocation6 + $0x8] sm:$0xff] }
  0x20   :  { %s37_s1 = sld [smem:[#allocation2]]  ;;  %s85_s6 = sld [smem:[#allocation2 + $0x3]] }
  0x21   :  { %s159_s7 = smov [#allocation7]  }
  0x22   :  { %s70_s8 = sshll.u32 %s159_s7, 4  ;;  %s71_s8 = int_to_ptr.vmem [resolvable:$true] %s70_s8 }
  0x23   :  { %s127_s9 = scalar_lea.vmem %s71_s8, 256  ;;  %p132_p12 = scmp.lt.s32.totalorder %s71_s8, %s71_s8 }
  0x24   :  { %p128_p11 = scmp.ne.s32.totalorder %s71_s8, %s127_s9  ;;  %p133_p13 = scmp.lt.s32.totalorder %s127_s9, %s127_s9 }
  0x25   :  { %v43_v2 = vstv %s83_s4  ;;  %v46_v4 = vstv %s84_s5 }
  0x26   :  { %v44_v3 = vmul.f32 %v43_v2, %v41_v0  ;;  %v45_v5 = vmul.f32 %v43_v2, %v42_v1  ;;  %v55_v11 = vstv %s37_s1  ;;  %v60_v16 = vstv %s85_s6  ;;  %p134_p0 = por %p133_p13, %p132_p12 }
  0x28   :  { %v47_v6 = vadd.f32 %v46_v4, %v44_v3  ;;  %v48_v7 = vadd.f32 %v46_v4, %v45_v5  ;;  %p135_p1 = pnand %p134_p0, %p128_p11 }
  0x2a   :  { %v49_v8 = vmul.f32 1.442695, %v47_v6  ;;  %v51_v9 = vmul.f32 1.442695, %v48_v7 }
  0x2c   :  { %91 = vpow2.f32 %v49_v8 }
  0x2d   :  { %93 = vpow2.f32 %v51_v9 }
  0x36   :  { %v92_v10 = vpop.eup %91 }
  0x37   :  { %v94_v12 = vpop.eup %93  ;;  %v53_v13 = vsub.f32 1.0, %v92_v10 }
  0x38   :  { %v54_v14 = vsub.f32 1.0, %v94_v12 }
  0x39   :  { %v56_v15 = vmul.f32 %v55_v11, %v53_v13 }
  0x3a   :  { %v57_v17 = vmul.f32 %v55_v11, %v54_v14 }
  0x3b   :  { %v58_v18 = vmul.f32 %v56_v15, %v53_v13 }
  0x3c   :  { %v59_v19 = vmul.f32 %v57_v17, %v54_v14 }
  0x3d   :  { %v61_v20 = vadd.f32 %v60_v16, %v58_v18 }
  0x3e   :  { %v62_v21 = vadd.f32 %v60_v16, %v59_v19 }
  0x3f   :  { %63 = vst [vmem:[#allocation7] sm:$0xff] %v61_v20 }
  0x40   :  { %64 = vst [vmem:[#allocation7 + $0x8] sm:$0xff] %v62_v21 }
  0x41   :  { %138 = shalt.err (!%p135_p1)
}
  0x42   :  { %s139_s12 = scalar_lea.hbm %s219_s2, 256 }
  0x43   :  { %p140_p2 = scmp.ne.s32.totalorder %s219_s2, %s139_s12  ;;  %p143_p3 = scmp.lt.u32.totalorder %s139_s12, %s219_s2 }
  0x45   :  { %p145_p4 = pnand %p143_p3, %p140_p2 }
  0x47   :  { %148 = shalt.err (!%p145_p4)
}
  0x48   :  { %76 = dma.vmem_to_hbm [thread:$0]  %s71_s8, 256, %s219_s2, [#allocation4], %s157_s0, %s157_s0, %s158_s29  }
  0x49   :  { %153 = dma.done.wait [#allocation4], 256  }
  0x4a   :  { %154 = vsyncadd [#allocation4], 4294967040 }
  0x4b   :  { %80 = vsyncpa [#allocation3], 1 }
  0x4c   :  { %81 = vsyncpa [#allocation4], 1 }
  0x4d   :  { %82 = vsyncpa [#allocation5], 1 }

</bundles_post_ra>
